<compile_context>
chip_gen: v6e
topology: v6e:2x2x1
jax: 0.10.0
libtpu: 0.0.40
codegen_flags: <defaults>
</compile_context>

<pallas_src>
import functools
import math

import jax
import jax.numpy as jnp
from jax import lax
from jax.experimental import pallas as pl
from jax.experimental.pallas import tpu as pltpu

_CLAMP_MIN = 1e-4
_CLAMP_MAX = 1.0 - 1e-4
_LOG_CLAMP_MIN = math.log(_CLAMP_MIN)
_LOG_CLAMP_MAX = math.log(_CLAMP_MAX)

_BLOCK_BYTES_TARGET = 2 * 1024 * 1024   # per-input DMA block target (~2 MiB)
_F32_TEMP_BLOCKS = 8                     # conservative live (tile_n, C) f32 temps
_VMEM_HEADROOM = 2 * 1024 * 1024


def _vmem_limit_bytes():
    """Generation-dependent scoped-VMEM limit with a safe fallback."""
    cap = None
    try:
        cap = int(pltpu.get_tpu_info().vmem_capacity_bytes)
    except Exception:
        cap = None
    if not cap:
        cap = 64 * 1024 * 1024  # conservative: v7x per-TC physical VMEM
    # Use ~3/4 of physical, clamped: 48 MiB on v7x (64 MiB phys),
    # 96 MiB on v5e/v6e (128 MiB phys).
    return int(min(max(cap * 3 // 4, 32 * 1024 * 1024), 96 * 1024 * 1024))


def _choose_tile_n(n, c, itemsize, vmem_limit):
    """Pick tile rows by byte budget; prefer a divisor of n (no ragged mask)."""
    in_row = c * itemsize          # one row of one input block
    tmp_row = c * 4                # one row of one f32 in-kernel temporary
    # 2 inputs x 2 pipeline buffers of the input dtype + f32 temporaries.
    vmem_per_row = 4 * in_row + _F32_TEMP_BLOCKS * tmp_row
    rows_by_vmem = (vmem_limit - _VMEM_HEADROOM) // vmem_per_row
    rows_by_target = max(1, _BLOCK_BYTES_TARGET // in_row)
    max_rows = min(rows_by_vmem, rows_by_target)
    if max_rows < 8:
        # TODO(synk): class-axis blocking (online softmax over C tiles) would
        # handle this; fail loudly rather than spill / blow the VMEM limit.
        raise ValueError(
            f"DMLLoss Pallas kernel: num_classes={c} too large for VMEM "
            f"(an 8-row tile needs ~{8 * vmem_per_row} bytes, "
            f"limit {vmem_limit} bytes).")
    if n <= max_rows:
        return n, False                       # whole array in one block (legal shape)
    max_rows = (max_rows // 8) * 8
    if n % 8 == 0:
        # Largest multiple-of-8 divisor of n within budget -> mask-free tiling.
        for rows in range(max_rows, 7, -8):
            if n % rows == 0:
                return rows, False
    return max_rows, True                     # ragged last tile: mask padded rows


def _dml_loss_kernel(stu_ref, tea_ref, out_ref, *, temperature, batch_size,
                     tile_n, mask_rows):
    inv_t = jnp.float32(1.0 / temperature)
    stu = stu_ref[...].astype(jnp.float32) * inv_t
    tea = tea_ref[...].astype(jnp.float32) * inv_t

    if mask_rows:
        # Ragged last tile: zero the padded rows of BOTH inputs, so both
        # softmaxes become identical (uniform) there and contribute exactly 0.
        # (tile_n, 1) iota + broadcast in the where keeps the mask cheap.
        row0 = pl.program_id(0) * tile_n
        row = lax.broadcasted_iota(jnp.int32, (tile_n, 1), 0) + row0
        valid = row < batch_size
        stu = jnp.where(valid, stu, 0.0)
        tea = jnp.where(valid, tea, 0.0)

    def _probs_logprobs(x):
        m = jnp.max(x, axis=-1, keepdims=True)
        s = x - m
        e = jnp.exp(s)                               # one EUP exp per element
        se = jnp.sum(e, axis=-1, keepdims=True)
        p = jnp.clip(e * pl.reciprocal(se, approx=False), _CLAMP_MIN, _CLAMP_MAX)
        # clip-then-log == clip(log) since log is monotone -> per-row log only.
        logp = jnp.clip(s - jnp.log(se), _LOG_CLAMP_MIN, _LOG_CLAMP_MAX)
        return p, logp

    stu_p, stu_logp = _probs_logprobs(stu)
    tea_p, tea_logp = _probs_logprobs(tea)

    # tea_p*(tea_logp - stu_logp) + stu_p*(stu_logp - tea_logp), fused.
    contrib = (tea_p - stu_p) * (tea_logp - stu_logp)

    partial = jnp.sum(contrib, axis=-1, keepdims=True)   # (tile_n, 1) lane reduce
    partial = jnp.sum(partial, axis=0, keepdims=True)    # (1, 1)    sublane reduce
    out_ref[...] = partial.reshape(1, 1, 1)


def dml_loss(stu_preds, tea_preds, temperature, *, tile_n=None):
    """Pallas implementation of DMLLoss(T).forward(stu_preds, tea_preds)."""
    assert stu_preds.shape == tea_preds.shape
    n, c = stu_preds.shape
    itemsize = jnp.dtype(stu_preds.dtype).itemsize
    vmem_limit = _vmem_limit_bytes()

    if tile_n is None:
        tile_n, mask_rows = _choose_tile_n(n, c, itemsize, vmem_limit)
    else:
        tile_n = int(min(tile_n, n))
        mask_rows = (n % tile_n) != 0
    num_tiles = pl.cdiv(n, tile_n)

    kernel = functools.partial(
        _dml_loss_kernel,
        temperature=float(temperature),
        batch_size=int(n),
        tile_n=int(tile_n),
        mask_rows=bool(mask_rows),
    )

    partials = pl.pallas_call(
        kernel,
        out_shape=jax.ShapeDtypeStruct((num_tiles, 1, 1), jnp.float32),
        grid_spec=pltpu.PrefetchScalarGridSpec(
            num_scalar_prefetch=0,
            grid=(num_tiles,),
            in_specs=[
                pl.BlockSpec((tile_n, c), lambda i: (i, 0)),
                pl.BlockSpec((tile_n, c), lambda i: (i, 0)),
            ],
            # Per-tile scalar partial sums: independent output blocks, so the
            # grid axis can be "parallel" (both TensorCores on v7x).
            out_specs=pl.BlockSpec((1, 1, 1), lambda i: (i, 0, 0)),
        ),
        compiler_params=pltpu.CompilerParams(
            dimension_semantics=("parallel",),
            vmem_limit_bytes=int(vmem_limit),
        ),
    )(stu_preds, tea_preds)

    t = float(temperature)
    scale = jnp.float32(t * t * 0.5 / n)
    return jnp.sum(partials) * scale


def _dml_loss_ref(stu_preds, tea_preds, temperature):
    """Pure-JAX reference mirroring the PyTorch module (kl_div batchmean)."""
    t = temperature
    stu_p = jnp.clip(jax.nn.softmax(stu_preds / t, axis=1), _CLAMP_MIN, _CLAMP_MAX)
    tea_p = jnp.clip(jax.nn.softmax(tea_preds / t, axis=1), _CLAMP_MIN, _CLAMP_MAX)
    stu_logp = jnp.log(stu_p)
    tea_logp = jnp.log(tea_p)
    n = stu_preds.shape[0]
    kl1 = jnp.sum(tea_p * (jnp.log(tea_p) - stu_logp)) / n
    kl2 = jnp.sum(stu_p * (jnp.log(stu_p) - tea_logp)) / n
    return (kl1 * t**2 + kl2 * t**2) / 2.0


if __name__ == "__main__":
    T = 4.0
    key = jax.random.PRNGKey(0)
    k1, k2, k3, k4, k5, k6 = jax.random.split(key, 6)

    # Case 1: small (N, C) logits, single whole-array tile (auto tile choice).
    stu = jax.random.normal(k1, (8, 32), dtype=jnp.float32)
    tea = jax.random.normal(k2, (8, 32), dtype=jnp.float32)
    loss = dml_loss(stu, tea, T)
    jax.block_until_ready(loss)
    ref = _dml_loss_ref(stu, tea, T)
    assert jnp.allclose(loss, ref, rtol=1e-5, atol=1e-6), (loss, ref)

    # Case 2: multi-tile with a divisor tile size -> mask-free parallel partials.
    stu2 = jax.random.normal(k3, (24, 32), dtype=jnp.float32)
    tea2 = jax.random.normal(k4, (24, 32), dtype=jnp.float32)
    loss2 = dml_loss(stu2, tea2, T, tile_n=8)
    jax.block_until_ready(loss2)
    ref2 = _dml_loss_ref(stu2, tea2, T)
    assert jnp.allclose(loss2, ref2, rtol=1e-5, atol=1e-6), (loss2, ref2)

    # Case 3: multi-tile with a ragged last tile (exercises padded-row masking).
    stu3 = jax.random.normal(k5, (20, 32), dtype=jnp.float32)
    tea3 = jax.random.normal(k6, (20, 32), dtype=jnp.float32)
    loss3 = dml_loss(stu3, tea3, T, tile_n=8)
    jax.block_until_ready(loss3)
    ref3 = _dml_loss_ref(stu3, tea3, T)
    assert jnp.allclose(loss3, ref3, rtol=1e-5, atol=1e-6), (loss3, ref3)

    print("KERNEL_OK")
</pallas_src>

<mosaic_0001>
module attributes {stable_mosaic.version = 11 : i64} {
  func.func @_dml_loss_kernel(%arg0: i32, %arg1: memref<8x32xf32, #tpu.memory_space<vmem>>, %arg2: memref<8x32xf32, #tpu.memory_space<vmem>>, %arg3: memref<1x1x1xf32, #tpu.memory_space<vmem>>) attributes {dimension_semantics = [#tpu.dimension_semantics<parallel>], iteration_bounds = array<i64: 1>, scalar_prefetch = 0 : i64, scratch_operands = 0 : i64, tpu.core_type = #tpu.core_type<tc>, window_params = [{transform_indices = @transform_0, window_bounds = array<i64: 8, 32>}, {transform_indices = @transform_1, window_bounds = array<i64: 8, 32>}, {transform_indices = @transform_2, window_bounds = array<i64: 1, 1, 1>}]} {
    %c0 = arith.constant 0 : index
    %c0_0 = arith.constant 0 : index
    %0 = vector.load %arg1[%c0, %c0_0] : memref<8x32xf32, #tpu.memory_space<vmem>>, vector<8x32xf32>
    %cst = arith.constant 2.500000e-01 : f32
    %1 = vector.broadcast %cst : f32 to vector<8x32xf32>
    %2 = arith.mulf %0, %1 : vector<8x32xf32>
    %c0_1 = arith.constant 0 : index
    %c0_2 = arith.constant 0 : index
    %3 = vector.load %arg2[%c0_1, %c0_2] : memref<8x32xf32, #tpu.memory_space<vmem>>, vector<8x32xf32>
    %cst_3 = arith.constant 2.500000e-01 : f32
    %4 = vector.broadcast %cst_3 : f32 to vector<8x32xf32>
    %5 = arith.mulf %3, %4 : vector<8x32xf32>
    %cst_4 = arith.constant dense<0xFF800000> : vector<8xf32>
    %6 = vector.multi_reduction <maximumf>, %2, %cst_4 [1] : vector<8x32xf32> to vector<8xf32>
    %7 = vector.shape_cast %6 : vector<8xf32> to vector<8x1xf32>
    %8 = vector.broadcast %7 : vector<8x1xf32> to vector<8x32xf32>
    %9 = arith.subf %2, %8 : vector<8x32xf32>
    %10 = math.exp %9 : vector<8x32xf32>
    %cst_5 = arith.constant dense<0.000000e+00> : vector<8xf32>
    %11 = vector.multi_reduction <add>, %10, %cst_5 [1] : vector<8x32xf32> to vector<8xf32>
    %12 = vector.shape_cast %11 : vector<8xf32> to vector<8x1xf32>
    %13 = tpu.reciprocal %12 : vector<8x1xf32> -> vector<8x1xf32>
    %14 = vector.broadcast %13 : vector<8x1xf32> to vector<8x32xf32>
    %15 = arith.mulf %10, %14 : vector<8x32xf32>
    %cst_6 = arith.constant 9.99999974E-5 : f32
    %cst_7 = arith.constant 0.999899983 : f32
    %16 = vector.broadcast %cst_6 : f32 to vector<8x32xf32>
    %17 = arith.maximumf %16, %15 : vector<8x32xf32>
    %18 = vector.broadcast %cst_7 : f32 to vector<8x32xf32>
    %19 = arith.minimumf %18, %17 : vector<8x32xf32>
    %20 = math.log %12 : vector<8x1xf32>
    %21 = vector.broadcast %20 : vector<8x1xf32> to vector<8x32xf32>
    %22 = arith.subf %9, %21 : vector<8x32xf32>
    %cst_8 = arith.constant -9.21034049 : f32
    %cst_9 = arith.constant -1.000050e-04 : f32
    %23 = vector.broadcast %cst_8 : f32 to vector<8x32xf32>
    %24 = arith.maximumf %23, %22 : vector<8x32xf32>
    %25 = vector.broadcast %cst_9 : f32 to vector<8x32xf32>
    %26 = arith.minimumf %25, %24 : vector<8x32xf32>
    %cst_10 = arith.constant dense<0xFF800000> : vector<8xf32>
    %27 = vector.multi_reduction <maximumf>, %5, %cst_10 [1] : vector<8x32xf32> to vector<8xf32>
    %28 = vector.shape_cast %27 : vector<8xf32> to vector<8x1xf32>
    %29 = vector.broadcast %28 : vector<8x1xf32> to vector<8x32xf32>
    %30 = arith.subf %5, %29 : vector<8x32xf32>
    %31 = math.exp %30 : vector<8x32xf32>
    %cst_11 = arith.constant dense<0.000000e+00> : vector<8xf32>
    %32 = vector.multi_reduction <add>, %31, %cst_11 [1] : vector<8x32xf32> to vector<8xf32>
    %33 = vector.shape_cast %32 : vector<8xf32> to vector<8x1xf32>
    %34 = tpu.reciprocal %33 : vector<8x1xf32> -> vector<8x1xf32>
    %35 = vector.broadcast %34 : vector<8x1xf32> to vector<8x32xf32>
    %36 = arith.mulf %31, %35 : vector<8x32xf32>
    %cst_12 = arith.constant 9.99999974E-5 : f32
    %cst_13 = arith.constant 0.999899983 : f32
    %37 = vector.broadcast %cst_12 : f32 to vector<8x32xf32>
    %38 = arith.maximumf %37, %36 : vector<8x32xf32>
    %39 = vector.broadcast %cst_13 : f32 to vector<8x32xf32>
    %40 = arith.minimumf %39, %38 : vector<8x32xf32>
    %41 = math.log %33 : vector<8x1xf32>
    %42 = vector.broadcast %41 : vector<8x1xf32> to vector<8x32xf32>
    %43 = arith.subf %30, %42 : vector<8x32xf32>
    %cst_14 = arith.constant -9.21034049 : f32
    %cst_15 = arith.constant -1.000050e-04 : f32
    %44 = vector.broadcast %cst_14 : f32 to vector<8x32xf32>
    %45 = arith.maximumf %44, %43 : vector<8x32xf32>
    %46 = vector.broadcast %cst_15 : f32 to vector<8x32xf32>
    %47 = arith.minimumf %46, %45 : vector<8x32xf32>
    %48 = arith.subf %40, %19 : vector<8x32xf32>
    %49 = arith.subf %47, %26 : vector<8x32xf32>
    %50 = arith.mulf %48, %49 : vector<8x32xf32>
    %cst_16 = arith.constant dense<0.000000e+00> : vector<8xf32>
    %51 = vector.multi_reduction <add>, %50, %cst_16 [1] : vector<8x32xf32> to vector<8xf32>
    %52 = vector.shape_cast %51 : vector<8xf32> to vector<8x1xf32>
    %cst_17 = arith.constant dense<0.000000e+00> : vector<1xf32>
    %53 = vector.multi_reduction <add>, %52, %cst_17 [0] : vector<8x1xf32> to vector<1xf32>
    %54 = vector.shape_cast %53 : vector<1xf32> to vector<1x1xf32>
    %55 = vector.shape_cast %54 : vector<1x1xf32> to vector<1x1x1xf32>
    %c0_18 = arith.constant 0 : index
    %c0_19 = arith.constant 0 : index
    %c0_20 = arith.constant 0 : index
    %56 = vector.load %arg3[%c0_18, %c0_19, %c0_20] : memref<1x1x1xf32, #tpu.memory_space<vmem>>, vector<1x1x1xf32>
    tpu.vector_store %arg3[%c0_18, %c0_19, %c0_20], %55 {strides = array<i32>} : memref<1x1x1xf32, #tpu.memory_space<vmem>>, vector<1x1x1xf32>,
    return
  }
  func.func @transform_0(%arg0: i32) -> (i32, i32) {
    %c0_i32 = arith.constant 0 : i32
    %c0_i32_0 = arith.constant 0 : i32
    return %arg0, %c0_i32 : i32, i32
  }
  func.func @transform_1(%arg0: i32) -> (i32, i32) {
    %c0_i32 = arith.constant 0 : i32
    %c0_i32_0 = arith.constant 0 : i32
    return %arg0, %c0_i32 : i32, i32
  }
  func.func @transform_2(%arg0: i32) -> (i32, i32, i32) {
    %c0_i32 = arith.constant 0 : i32
    %c0_i32_0 = arith.constant 0 : i32
    %c0_i32_1 = arith.constant 0 : i32
    return %arg0, %c0_i32, %c0_i32_0 : i32, i32, i32
  }
}

</mosaic_0001>

<bundles_post_ra>
// kernel: tpu_custom_call.1
= control target key start
LH: loop header
LB: loop body
LE: loop exit
PB: predicated region body
PF: predicated region fallthrough
CT: control target
= control target key end

     0   :  { %7 = vsyncpa [#allocation3], 0  ;;  %s220_s0 = inlined_call_operand.hbm [shape: f32[8,32], index: 0, kind: input, shape index: {}]   ;;  %s221_s1 = inlined_call_operand.hbm [shape: f32[8,32], index: 1, kind: input, shape index: {}]   ;;  %s222_s2 = inlined_call_operand.hbm [shape: f32[1,1,1], index: 2, kind: output, shape index: {}]  }
   0x1   :  { %8 = vsyncpa [#allocation6], 0 }
   0x2   :  { %9 = vsyncpa [#allocation4], 0  ;;  %s188_s9 = smov [#allocation2]   ;;  %s189_s11 = smov [#allocation5]  }
   0x3   :  { %s16_s10 = sshll.u32 %s188_s9, 4  ;;  %s26_s12 = sshll.u32 %s189_s11, 4  ;;  %s17_s10 = int_to_ptr.vmem [resolvable:$true] %s16_s10  ;;  %s27_s12 = int_to_ptr.vmem [resolvable:$true] %s26_s12 }
   0x4   :  { %s130_s13 = scalar_lea.vmem %s17_s10, 128  ;;  %p135_p1 = scmp.lt.s32.totalorder %s17_s10, %s17_s10 }
   0x5   :  { %p131_p0 = scmp.ne.s32.totalorder %s17_s10, %s130_s13  ;;  %p136_p2 = scmp.lt.s32.totalorder %s130_s13, %s130_s13 }
   0x7   :  { %p137_p3 = por %p136_p2, %p135_p1 }
   0x9   :  { %p138_p4 = pnand %p137_p3, %p131_p0 }
   0xb   :  { %141 = shalt.err (!%p138_p4)
}
   0xc   :  { %19 = dma.hbm_to_vmem [thread:$0]  %s220_s0, 128, %s17_s10, [#allocation3]  }
   0xd   :  { %s150_s16 = scalar_lea.vmem %s27_s12, 128  ;;  %p155_p6 = scmp.lt.s32.totalorder %s27_s12, %s27_s12 }
   0xe   :  { %p151_p5 = scmp.ne.s32.totalorder %s27_s12, %s150_s16  ;;  %p156_p7 = scmp.lt.s32.totalorder %s150_s16, %s150_s16 }
  0x10   :  { %p157_p8 = por %p156_p7, %p155_p6 }
  0x12   :  { %p158_p9 = pnand %p157_p8, %p151_p5 }
  0x14   :  { %161 = shalt.err (!%p158_p9)
}
  0x15   :  { %29 = dma.hbm_to_vmem [thread:$0]  %s221_s1, 128, %s27_s12, [#allocation6]  }
  0x16   :  { %182 = dma.done.wait [#allocation3], 128  }
  0x17   :  { %183 = vsyncadd [#allocation3], 4294967168 }
  0x18   :  { %184 = dma.done.wait [#allocation6], 128  }
  0x19   :  { %185 = vsyncadd [#allocation6], 4294967168  ;;  %v36_v0 = vld [vmem:[#allocation2] sm:$0xff]  ;;  %vm40_vm0 = vcmask 261120   ;;  %v38_v1 = vld [vmem:[#allocation5] sm:$0xff]  ;;  %s190_s0 = smov [#allocation7]  }
  0x1a   :  { %v37_v2 = vmul.f32 0.25, %v36_v0  ;;  %v39_v3 = vmul.f32 0.25, %v38_v1  ;;  %s97_s1 = sshll.u32 %s190_s0, 4  ;;  %vm89_vm1 = vcmask 0   ;;  %s98_s1 = int_to_ptr.vmem [resolvable:$true] %s97_s1 }
  0x1b   :  { %s162_s19 = scalar_lea.vmem %s98_s1, 16  ;;  %s166_s20 = scalar_lea.vmem %s98_s1, 32 }
  0x1c   :  { %v41_v4 = vsel %vm40_vm0, %v37_v2, -inf  ;;  %v59_v5 = vsel %vm40_vm0, %v39_v3, -inf  ;;  %p163_p10 = scmp.ne.s32.totalorder %s98_s1, %s162_s19  ;;  %p167_p11 = scmp.lt.s32.totalorder %s98_s1, %s98_s1 }
  0x1d   :  { %42 = vmax.xlane.f32.xlu0 %v41_v4  ;;  %p168_p12 = scmp.lt.s32.totalorder %s166_s20, %s162_s19 }
  0x1f   :  { %p169_p13 = por %p168_p12, %p167_p11 }
  0x21   :  { %60 = vmax.xlane.f32.xlu0 %v59_v5  ;;  %p170_p0 = pnand %p169_p13, %p163_p10 }
  0xa6   :  { %v43_v6 = vpop.xlane.xlu0 %42 }
  0xa7   :  { %v44_v7 = vsub.f32 %v37_v2, %v43_v6 }
  0xa9   :  { %v45_v8 = vmul.f32 1.442695, %v44_v7 }
  0xaa   :  { %v61_v9 = vpop.xlane.xlu0 %60 }
  0xab   :  { %110 = vpow2.f32 %v45_v8  ;;  %v62_v10 = vsub.f32 %v39_v3, %v61_v9 }
  0xad   :  { %v63_v11 = vmul.f32 1.442695, %v62_v10 }
  0xaf   :  { %112 = vpow2.f32 %v63_v11 }
  0xb8   :  { %v111_v12 = vpop.eup %110 }
  0xb9   :  { %v47_v13 = vsel %vm40_vm0, %v111_v12, 0.0 }
  0xba   :  { %48 = vadd.xlane.f32.xlu1 %v47_v13 }
  0xbc   :  { %v113_v14 = vpop.eup %112 }
  0xbd   :  { %v65_v15 = vsel %vm40_vm0, %v113_v14, 0.0 }
  0xbe   :  { %66 = vadd.xlane.f32.xlu1 %v65_v15 }
 0x143   :  { %v49_v16 = vpop.xlane.xlu1 %48 }
 0x144   :  { %114 = vrcp.f32 %v49_v16 }
 0x145   :  { %116 = vlog2.f32 %v49_v16 }
 0x147   :  { %v67_v17 = vpop.xlane.xlu1 %66 }
 0x148   :  { %118 = vrcp.f32 %v67_v17 }
 0x149   :  { %120 = vlog2.f32 %v67_v17 }
 0x151   :  { %v115_v18 = vpop.eup %114 }
 0x152   :  { %v117_v19 = vpop.eup %116  ;;  %v51_v23 = vmul.f32 %v115_v18, %v111_v12 }
 0x153   :  { %v55_v20 = vmul.f32 0.6931472, %v117_v19 }
 0x154   :  { %v52_v29 = vmax.f32 %v51_v23, 0.0001 }
 0x155   :  { %v119_v21 = vpop.eup %118  ;;  %v56_v22 = vsub.f32 %v44_v7, %v55_v20 }
 0x156   :  { %v121_v24 = vpop.eup %120  ;;  %v69_v25 = vmul.f32 %v119_v21, %v113_v14  ;;  %v53_v33 = vmin.f32 %v52_v29, 0.9999 }
 0x157   :  { %v73_v26 = vmul.f32 0.6931472, %v121_v24  ;;  %v57_v30 = vmax.f32 %v56_v22, -9.2103405 }
 0x158   :  { %v70_v27 = vmax.f32 %v69_v25, 0.0001 }
 0x159   :  { %v74_v28 = vsub.f32 %v62_v10, %v73_v26  ;;  %v58_v34 = vmin.f32 %v57_v30, -0.000100005 }
 0x15a   :  { %v71_v32 = vmin.f32 %v70_v27, 0.9999 }
 0x15b   :  { %v75_v31 = vmax.f32 %v74_v28, -9.2103405 }
 0x15c   :  { %v77_v36 = vsub.f32 %v71_v32, %v53_v33 }
 0x15d   :  { %v76_v35 = vmin.f32 %v75_v31, -0.000100005 }
 0x15f   :  { %v78_v37 = vsub.f32 %v76_v35, %v58_v34 }
 0x161   :  { %v79_v38 = vmul.f32 %v78_v37, %v77_v36 }
 0x163   :  { %v80_v39 = vsel %vm40_vm0, %v79_v38, 0.0 }
 0x164   :  { %81 = vadd.xlane.f32.xlu0 %v80_v39 }
 0x1ed   :  { %v82_v40 = vpop.xlane.xlu0 %81 }
 0x1ee   :  { %v83_v41 = vrot.slane %v82_v40, 4 }
 0x1f0   :  { %v84_v42 = vadd.f32 %v83_v41, %v82_v40 }
 0x1f2   :  { %v85_v43 = vrot.slane %v84_v42, 2 }
 0x1f4   :  { %v86_v44 = vadd.f32 %v85_v43, %v84_v42 }
 0x1f6   :  { %v87_v45 = vrot.slane %v86_v44, 1 }
 0x1f8   :  { %v88_v46 = vadd.f32 %v87_v45, %v86_v44 }
 0x1fa   :  { %90 = vst.msk [vmem:[#allocation7] sm:$0x1] %vm89_vm1, %v88_v46 }
 0x1fb   :  { %173 = shalt.err (!%p170_p0)
}
 0x1fc   :  { %100 = dma.vmem_to_hbm [thread:$0]  %s98_s1, 16, %s222_s2, [#allocation4]  }
 0x1fd   :  { %186 = dma.done.wait [#allocation4], 16  }
 0x1fe   :  { %187 = vsyncadd [#allocation4], 4294967280 }
 0x1ff   :  { %104 = vsyncpa [#allocation3], 1 }
 0x200   :  { %105 = vsyncpa [#allocation6], 1 }
 0x201   :  { %106 = vsyncpa [#allocation4], 1 }

</bundles_post_ra>
